<compile_context>
chip_gen: v5e
topology: v5e:2x2
jax: 0.10.0
libtpu: 0.0.40
codegen_flags: <defaults>
</compile_context>

<pallas_src>
import functools

import jax
import jax.numpy as jnp
import numpy as np
from jax.experimental import pallas as pl
from jax.experimental.pallas import tpu as pltpu


# ----------------------------- Pallas kernel --------------------------------

def sffn_fused_kernel(x_ref, aggw_ref, projw_ref, w1_ref, avg_ref,
                      gamma_ref, beta_ref, out_ref, *, num_blocks, eps):
    """Fused TCE + SFFN-blocks forward for one batch tile.

    x_ref     : (TB, F*E)  f32   flattened embeddings for this batch tile
    aggw_ref  : (F*E, F*P) bf16  per-field aggregation weights packed along N
    projw_ref : (F*P, F*E) bf16  per-field projection weights, block-diagonal
    w1_ref    : (F*E, F*E) bf16  W1 replicated block-diagonally (one copy per field)
    avg_ref   : (F*E, F*E) f32   block-diag ones(E,E)/E -> per-field mean broadcast
    gamma_ref : (1, F*E)   f32   LayerNorm gamma tiled across fields
    beta_ref  : (1, F*E)   f32
    out_ref   : (TB, F*E)  f32
    """
    x = x_ref[...]                                                     # (TB, F*E) f32

    # ---- TCE: one wide aggregation matmul + one block-diag projection matmul ----
    x_agg = jnp.maximum(
        jnp.dot(x.astype(jnp.bfloat16), aggw_ref[...],
                preferred_element_type=jnp.float32), 0.0)              # (TB, F*P)
    x_proj = jnp.dot(x_agg.astype(jnp.bfloat16), projw_ref[...],
                     preferred_element_type=jnp.float32)               # (TB, F*E)
    y = x * jnp.maximum(x_proj, 0.0)                                   # (TB, F*E) f32

    w1 = w1_ref[...]
    avg = avg_ref[...]
    # Broadcast gamma/beta once (hoisted: JAX does not CSE broadcast_in_dim).
    gamma = jnp.broadcast_to(gamma_ref[...], y.shape)
    beta = jnp.broadcast_to(beta_ref[...], y.shape)

    for _ in range(num_blocks):            # static unroll; num_blocks is small
        z = jnp.dot(y.astype(jnp.bfloat16), w1,
                    preferred_element_type=jnp.float32)                # (TB, F*E)
        # per-field LayerNorm statistics via the averaging matmul (single pass)
        m = jnp.dot(z, avg, preferred_element_type=jnp.float32)        # mean, bcast
        m2 = jnp.dot(z * z, avg, preferred_element_type=jnp.float32)   # E[z^2], bcast
        var = m2 - m * m
        y = (z - m) * jax.lax.rsqrt(var + eps) * gamma + beta
    out_ref[...] = y


# ------------------------------ JAX wrapper ---------------------------------

def sffn_forward(x_emb, agg_w, proj_w, w1, ln_gamma, ln_beta,
                 num_blocks=3, eps=1e-5, batch_tile=512):
    B, F, E = x_emb.shape
    P = agg_w.shape[-1]
    FE, FP = F * E, F * P

    # ---- pack parameters once (trace-time; no per-field work left in the kernel) ----
    agg_packed = (jnp.transpose(agg_w, (1, 0, 2))
                  .reshape(FE, FP).astype(jnp.bfloat16))               # (FE, FP)
    proj_blk = jax.scipy.linalg.block_diag(
        *[proj_w[f] for f in range(F)]).astype(jnp.bfloat16)           # (FP, FE)
    w1_blk = jnp.kron(jnp.eye(F, dtype=w1.dtype), w1).astype(jnp.bfloat16)   # (FE, FE)
    avg_blk = jnp.kron(jnp.eye(F, dtype=jnp.float32),
                       jnp.full((E, E), 1.0 / E, jnp.float32))         # (FE, FE)
    gamma_t = jnp.tile(ln_gamma.reshape(1, E), (1, F)).astype(jnp.float32)
    beta_t = jnp.tile(ln_beta.reshape(1, E), (1, F)).astype(jnp.float32)

    x_flat = x_emb.reshape(B, FE).astype(jnp.float32)   # free, lane-major layout

    # batch tiling: keeps VMEM bounded at production batch sizes (v7x: 64 MiB/TC)
    tb = B if B <= batch_tile else batch_tile           # batch_tile % 8 == 0
    grid = (pl.cdiv(B, tb),)

    out_flat = pl.pallas_call(
        functools.partial(sffn_fused_kernel, num_blocks=num_blocks, eps=eps),
        out_shape=jax.ShapeDtypeStruct((B, FE), jnp.float32),
        grid=grid,
        in_specs=[
            pl.BlockSpec((tb, FE), lambda i: (i, 0)),    # x tile
            pl.BlockSpec((FE, FP), lambda i: (0, 0)),    # packed agg weights
            pl.BlockSpec((FP, FE), lambda i: (0, 0)),    # block-diag proj weights
            pl.BlockSpec((FE, FE), lambda i: (0, 0)),    # block-diag W1
            pl.BlockSpec((FE, FE), lambda i: (0, 0)),    # averaging matrix
            pl.BlockSpec((1, FE), lambda i: (0, 0)),     # gamma (tiled)
            pl.BlockSpec((1, FE), lambda i: (0, 0)),     # beta  (tiled)
        ],
        out_specs=pl.BlockSpec((tb, FE), lambda i: (i, 0)),
        compiler_params=pltpu.CompilerParams(
            dimension_semantics=("parallel",)),
    )(x_flat, agg_packed, proj_blk, w1_blk, avg_blk, gamma_t, beta_t)

    return out_flat.reshape(B, F, E), None


# ------------------------ deterministic parameter init ----------------------

def xavier_uniform(key, shape):
    receptive = int(np.prod(shape[2:])) if len(shape) > 2 else 1
    fan_in = shape[1] * receptive
    fan_out = shape[0] * receptive
    bound = float(np.sqrt(6.0 / (fan_in + fan_out)))
    return jax.random.uniform(key, shape, jnp.float32, -bound, bound)


def init_params(key, field_length, embed_dim, project_dim):
    k1, k2, k3 = jax.random.split(key, 3)
    input_dim = field_length * embed_dim
    agg_w = xavier_uniform(k1, (field_length, input_dim, project_dim))
    proj_w = xavier_uniform(k2, (field_length, project_dim, embed_dim))
    w1 = xavier_uniform(k3, (1, embed_dim, embed_dim))[0]   # stored as (E, E)
    ln_gamma = jnp.ones((1, embed_dim), jnp.float32)
    ln_beta = jnp.zeros((1, embed_dim), jnp.float32)
    return agg_w, proj_w, w1, ln_gamma, ln_beta


# ------------------------------ references ----------------------------------

def sffn_reference_f32(x_emb, agg_w, proj_w, w1, ln_gamma, ln_beta,
                       num_blocks=3, eps=1e-5):
    """PyTorch-faithful full-f32 reference."""
    B, F, E = x_emb.shape
    x_cat = jnp.broadcast_to(x_emb.reshape(B, F * E)[None], (F, B, F * E))
    x_agg = jax.nn.relu(jnp.einsum("fbi,fip->fbp", x_cat, agg_w))
    x_proj = jnp.einsum("fbp,fpe->fbe", x_agg, proj_w).transpose(1, 0, 2)
    y = x_emb * jax.nn.relu(x_proj)
    for _ in range(num_blocks):
        z = jnp.einsum("bfe,ed->bfd", y, w1)
        mean = jnp.mean(z, axis=-1, keepdims=True)
        var = jnp.mean(jnp.square(z - mean), axis=-1, keepdims=True)
        y = (z - mean) * jax.lax.rsqrt(var + eps) * ln_gamma + ln_beta
    return y


def sffn_reference_bf16(x_emb, agg_w, proj_w, w1, ln_gamma, ln_beta,
                        num_blocks=3, eps=1e-5):
    """Per-field (unpacked) reference with the kernel's precision policy:
    bf16 MXU operands, f32 accumulation, f32 LayerNorm statistics."""
    B, F, E = x_emb.shape
    bf = jnp.bfloat16
    x_flat = x_emb.reshape(B, F * E)
    x_agg = jax.nn.relu(jnp.einsum("bi,fip->fbp", x_flat.astype(bf),
                                   agg_w.astype(bf),
                                   preferred_element_type=jnp.float32))
    x_proj = jnp.einsum("fbp,fpe->bfe", x_agg.astype(bf), proj_w.astype(bf),
                        preferred_element_type=jnp.float32)
    y = x_emb * jax.nn.relu(x_proj)
    for _ in range(num_blocks):
        z = jnp.einsum("bfe,ed->bfd", y.astype(bf), w1.astype(bf),
                       preferred_element_type=jnp.float32)
        mean = jnp.mean(z, axis=-1, keepdims=True)
        var = jnp.mean(z * z, axis=-1, keepdims=True) - mean * mean
        y = (z - mean) * jax.lax.rsqrt(var + eps) * ln_gamma + ln_beta
    return y


# --------------------------------- main --------------------------------------

if __name__ == "__main__":
    B, F, E, P = 2, 4, 16, 32
    NUM_BLOCKS = 3

    key = jax.random.PRNGKey(0)
    k_x, k_params = jax.random.split(key)
    x_emb = jax.random.normal(k_x, (B, F, E), jnp.float32)
    agg_w, proj_w, w1, ln_gamma, ln_beta = init_params(k_params, F, E, P)

    out, aux = sffn_forward(x_emb, agg_w, proj_w, w1, ln_gamma, ln_beta,
                            num_blocks=NUM_BLOCKS)
    out = jax.block_until_ready(out)
    assert aux is None
    assert out.shape == (B, F, E)

    # Tight check vs. a reference with the same bf16-MXU / f32-stats policy.
    ref_bf16 = sffn_reference_bf16(x_emb, agg_w, proj_w, w1, ln_gamma, ln_beta,
                                   num_blocks=NUM_BLOCKS)
    np.testing.assert_allclose(np.asarray(out), np.asarray(ref_bf16),
                               rtol=2e-3, atol=2e-3)

    # Sanity check vs. the PyTorch-faithful full-f32 reference (bf16-level tol).
    ref_f32 = sffn_reference_f32(x_emb, agg_w, proj_w, w1, ln_gamma, ln_beta,
                                 num_blocks=NUM_BLOCKS)
    np.testing.assert_allclose(np.asarray(out), np.asarray(ref_f32),
                               rtol=1e-1, atol=1e-1)

    print("KERNEL_OK")
</pallas_src>

<mosaic_0001>
module attributes {stable_mosaic.version = 11 : i64} {
  func.func @sffn_fused_kernel(%arg0: i32, %arg1: memref<2x64xf32, #tpu.memory_space<vmem>>, %arg2: memref<64x128xbf16, #tpu.memory_space<vmem>>, %arg3: memref<128x64xbf16, #tpu.memory_space<vmem>>, %arg4: memref<64x64xbf16, #tpu.memory_space<vmem>>, %arg5: memref<64x64xf32, #tpu.memory_space<vmem>>, %arg6: memref<1x64xf32, #tpu.memory_space<vmem>>, %arg7: memref<1x64xf32, #tpu.memory_space<vmem>>, %arg8: memref<2x64xf32, #tpu.memory_space<vmem>>) attributes {dimension_semantics = [#tpu.dimension_semantics<parallel>], iteration_bounds = array<i64: 1>, scalar_prefetch = 0 : i64, scratch_operands = 0 : i64, tpu.core_type = #tpu.core_type<tc>, window_params = [{transform_indices = @transform_0, window_bounds = array<i64: 2, 64>}, {pipeline_mode = #tpu.pipeline_mode<synchronous>, transform_indices = @transform_1, window_bounds = array<i64: 64, 128>}, {pipeline_mode = #tpu.pipeline_mode<synchronous>, transform_indices = @transform_2, window_bounds = array<i64: 128, 64>}, {pipeline_mode = #tpu.pipeline_mode<synchronous>, transform_indices = @transform_3, window_bounds = array<i64: 64, 64>}, {pipeline_mode = #tpu.pipeline_mode<synchronous>, transform_indices = @transform_4, window_bounds = array<i64: 64, 64>}, {pipeline_mode = #tpu.pipeline_mode<synchronous>, transform_indices = @transform_5, window_bounds = array<i64: 1, 64>}, {pipeline_mode = #tpu.pipeline_mode<synchronous>, transform_indices = @transform_6, window_bounds = array<i64: 1, 64>}, {transform_indices = @transform_7, window_bounds = array<i64: 2, 64>}]} {
    %c0 = arith.constant 0 : index
    %c0_0 = arith.constant 0 : index
    %0 = vector.load %arg1[%c0, %c0_0] : memref<2x64xf32, #tpu.memory_space<vmem>>, vector<2x64xf32>
    %1 = arith.truncf %0 : vector<2x64xf32> to vector<2x64xbf16>
    %c0_1 = arith.constant 0 : index
    %c0_2 = arith.constant 0 : index
    %2 = vector.load %arg2[%c0_1, %c0_2] : memref<64x128xbf16, #tpu.memory_space<vmem>>, vector<64x128xbf16>
    %cst = arith.constant dense<0.000000e+00> : vector<2x128xf32>
    %3 = tpu.matmul %1, %2, %cst {dimension_numbers = #tpu.dot_dimension_numbers<[1], [0], [0], [1], [0, 0, 1, 1], [], []>} : vector<2x64xbf16>, vector<64x128xbf16>, vector<2x128xf32> -> vector<2x128xf32>
    %cst_3 = arith.constant 0.000000e+00 : f32
    %4 = vector.broadcast %cst_3 : f32 to vector<2x128xf32>
    %5 = arith.maximumf %3, %4 : vector<2x128xf32>
    %6 = arith.truncf %5 : vector<2x128xf32> to vector<2x128xbf16>
    %c0_4 = arith.constant 0 : index
    %c0_5 = arith.constant 0 : index
    %7 = vector.load %arg3[%c0_4, %c0_5] : memref<128x64xbf16, #tpu.memory_space<vmem>>, vector<128x64xbf16>
    %cst_6 = arith.constant dense<0.000000e+00> : vector<2x64xf32>
    %8 = tpu.matmul %6, %7, %cst_6 {dimension_numbers = #tpu.dot_dimension_numbers<[1], [0], [0], [1], [0, 0, 1, 1], [], []>} : vector<2x128xbf16>, vector<128x64xbf16>, vector<2x64xf32> -> vector<2x64xf32>
    %cst_7 = arith.constant 0.000000e+00 : f32
    %9 = vector.broadcast %cst_7 : f32 to vector<2x64xf32>
    %10 = arith.maximumf %8, %9 : vector<2x64xf32>
    %11 = arith.mulf %0, %10 : vector<2x64xf32>
    %c0_8 = arith.constant 0 : index
    %c0_9 = arith.constant 0 : index
    %12 = vector.load %arg4[%c0_8, %c0_9] : memref<64x64xbf16, #tpu.memory_space<vmem>>, vector<64x64xbf16>
    %c0_10 = arith.constant 0 : index
    %c0_11 = arith.constant 0 : index
    %13 = vector.load %arg5[%c0_10, %c0_11] : memref<64x64xf32, #tpu.memory_space<vmem>>, vector<64x64xf32>
    %c0_12 = arith.constant 0 : index
    %c0_13 = arith.constant 0 : index
    %14 = vector.load %arg6[%c0_12, %c0_13] : memref<1x64xf32, #tpu.memory_space<vmem>>, vector<1x64xf32>
    %15 = vector.shape_cast %14 : vector<1x64xf32> to vector<1x64xf32>
    %16 = vector.broadcast %15 : vector<1x64xf32> to vector<2x64xf32>
    %c0_14 = arith.constant 0 : index
    %c0_15 = arith.constant 0 : index
    %17 = vector.load %arg7[%c0_14, %c0_15] : memref<1x64xf32, #tpu.memory_space<vmem>>, vector<1x64xf32>
    %18 = vector.shape_cast %17 : vector<1x64xf32> to vector<1x64xf32>
    %19 = vector.broadcast %18 : vector<1x64xf32> to vector<2x64xf32>
    %20 = arith.truncf %11 : vector<2x64xf32> to vector<2x64xbf16>
    %cst_16 = arith.constant dense<0.000000e+00> : vector<2x64xf32>
    %21 = tpu.matmul %20, %12, %cst_16 {dimension_numbers = #tpu.dot_dimension_numbers<[1], [0], [0], [1], [0, 0, 1, 1], [], []>} : vector<2x64xbf16>, vector<64x64xbf16>, vector<2x64xf32> -> vector<2x64xf32>
    %cst_17 = arith.constant dense<0.000000e+00> : vector<2x64xf32>
    %22 = tpu.matmul %21, %13, %cst_17 {dimension_numbers = #tpu.dot_dimension_numbers<[1], [0], [0], [1], [0, 0, 1, 1], [], []>} : vector<2x64xf32>, vector<64x64xf32>, vector<2x64xf32> -> vector<2x64xf32>
    %23 = arith.mulf %21, %21 : vector<2x64xf32>
    %cst_18 = arith.constant dense<0.000000e+00> : vector<2x64xf32>
    %24 = tpu.matmul %23, %13, %cst_18 {dimension_numbers = #tpu.dot_dimension_numbers<[1], [0], [0], [1], [0, 0, 1, 1], [], []>} : vector<2x64xf32>, vector<64x64xf32>, vector<2x64xf32> -> vector<2x64xf32>
    %25 = arith.mulf %22, %22 : vector<2x64xf32>
    %26 = arith.subf %24, %25 : vector<2x64xf32>
    %27 = arith.subf %21, %22 : vector<2x64xf32>
    %cst_19 = arith.constant 9.99999974E-6 : f32
    %28 = vector.broadcast %cst_19 : f32 to vector<2x64xf32>
    %29 = arith.addf %26, %28 : vector<2x64xf32>
    %30 = math.rsqrt %29 : vector<2x64xf32>
    %31 = arith.mulf %27, %30 : vector<2x64xf32>
    %32 = arith.mulf %31, %16 : vector<2x64xf32>
    %33 = arith.addf %32, %19 : vector<2x64xf32>
    %34 = arith.truncf %33 : vector<2x64xf32> to vector<2x64xbf16>
    %cst_20 = arith.constant dense<0.000000e+00> : vector<2x64xf32>
    %35 = tpu.matmul %34, %12, %cst_20 {dimension_numbers = #tpu.dot_dimension_numbers<[1], [0], [0], [1], [0, 0, 1, 1], [], []>} : vector<2x64xbf16>, vector<64x64xbf16>, vector<2x64xf32> -> vector<2x64xf32>
    %cst_21 = arith.constant dense<0.000000e+00> : vector<2x64xf32>
    %36 = tpu.matmul %35, %13, %cst_21 {dimension_numbers = #tpu.dot_dimension_numbers<[1], [0], [0], [1], [0, 0, 1, 1], [], []>} : vector<2x64xf32>, vector<64x64xf32>, vector<2x64xf32> -> vector<2x64xf32>
    %37 = arith.mulf %35, %35 : vector<2x64xf32>
    %cst_22 = arith.constant dense<0.000000e+00> : vector<2x64xf32>
    %38 = tpu.matmul %37, %13, %cst_22 {dimension_numbers = #tpu.dot_dimension_numbers<[1], [0], [0], [1], [0, 0, 1, 1], [], []>} : vector<2x64xf32>, vector<64x64xf32>, vector<2x64xf32> -> vector<2x64xf32>
    %39 = arith.mulf %36, %36 : vector<2x64xf32>
    %40 = arith.subf %38, %39 : vector<2x64xf32>
    %41 = arith.subf %35, %36 : vector<2x64xf32>
    %cst_23 = arith.constant 9.99999974E-6 : f32
    %42 = vector.broadcast %cst_23 : f32 to vector<2x64xf32>
    %43 = arith.addf %40, %42 : vector<2x64xf32>
    %44 = math.rsqrt %43 : vector<2x64xf32>
    %45 = arith.mulf %41, %44 : vector<2x64xf32>
    %46 = arith.mulf %45, %16 : vector<2x64xf32>
    %47 = arith.addf %46, %19 : vector<2x64xf32>
    %48 = arith.truncf %47 : vector<2x64xf32> to vector<2x64xbf16>
    %cst_24 = arith.constant dense<0.000000e+00> : vector<2x64xf32>
    %49 = tpu.matmul %48, %12, %cst_24 {dimension_numbers = #tpu.dot_dimension_numbers<[1], [0], [0], [1], [0, 0, 1, 1], [], []>} : vector<2x64xbf16>, vector<64x64xbf16>, vector<2x64xf32> -> vector<2x64xf32>
    %cst_25 = arith.constant dense<0.000000e+00> : vector<2x64xf32>
    %50 = tpu.matmul %49, %13, %cst_25 {dimension_numbers = #tpu.dot_dimension_numbers<[1], [0], [0], [1], [0, 0, 1, 1], [], []>} : vector<2x64xf32>, vector<64x64xf32>, vector<2x64xf32> -> vector<2x64xf32>
    %51 = arith.mulf %49, %49 : vector<2x64xf32>
    %cst_26 = arith.constant dense<0.000000e+00> : vector<2x64xf32>
    %52 = tpu.matmul %51, %13, %cst_26 {dimension_numbers = #tpu.dot_dimension_numbers<[1], [0], [0], [1], [0, 0, 1, 1], [], []>} : vector<2x64xf32>, vector<64x64xf32>, vector<2x64xf32> -> vector<2x64xf32>
    %53 = arith.mulf %50, %50 : vector<2x64xf32>
    %54 = arith.subf %52, %53 : vector<2x64xf32>
    %55 = arith.subf %49, %50 : vector<2x64xf32>
    %cst_27 = arith.constant 9.99999974E-6 : f32
    %56 = vector.broadcast %cst_27 : f32 to vector<2x64xf32>
    %57 = arith.addf %54, %56 : vector<2x64xf32>
    %58 = math.rsqrt %57 : vector<2x64xf32>
    %59 = arith.mulf %55, %58 : vector<2x64xf32>
    %60 = arith.mulf %59, %16 : vector<2x64xf32>
    %61 = arith.addf %60, %19 : vector<2x64xf32>
    %c0_28 = arith.constant 0 : index
    %c0_29 = arith.constant 0 : index
    %62 = vector.load %arg8[%c0_28, %c0_29] : memref<2x64xf32, #tpu.memory_space<vmem>>, vector<2x64xf32>
    tpu.vector_store %arg8[%c0_28, %c0_29], %61 {strides = array<i32>} : memref<2x64xf32, #tpu.memory_space<vmem>>, vector<2x64xf32>,
    return
  }
  func.func @transform_0(%arg0: i32) -> (i32, i32) {
    %c0_i32 = arith.constant 0 : i32
    %c0_i32_0 = arith.constant 0 : i32
    return %arg0, %c0_i32 : i32, i32
  }
  func.func @transform_1(%arg0: i32) -> (i32, i32) {
    %c0_i32 = arith.constant 0 : i32
    %c0_i32_0 = arith.constant 0 : i32
    %c0_i32_1 = arith.constant 0 : i32
    return %c0_i32, %c0_i32_0 : i32, i32
  }
  func.func @transform_2(%arg0: i32) -> (i32, i32) {
    %c0_i32 = arith.constant 0 : i32
    %c0_i32_0 = arith.constant 0 : i32
    %c0_i32_1 = arith.constant 0 : i32
    return %c0_i32, %c0_i32_0 : i32, i32
  }
  func.func @transform_3(%arg0: i32) -> (i32, i32) {
    %c0_i32 = arith.constant 0 : i32
    %c0_i32_0 = arith.constant 0 : i32
    %c0_i32_1 = arith.constant 0 : i32
    return %c0_i32, %c0_i32_0 : i32, i32
  }
  func.func @transform_4(%arg0: i32) -> (i32, i32) {
    %c0_i32 = arith.constant 0 : i32
    %c0_i32_0 = arith.constant 0 : i32
    %c0_i32_1 = arith.constant 0 : i32
    return %c0_i32, %c0_i32_0 : i32, i32
  }
  func.func @transform_5(%arg0: i32) -> (i32, i32) {
    %c0_i32 = arith.constant 0 : i32
    %c0_i32_0 = arith.constant 0 : i32
    %c0_i32_1 = arith.constant 0 : i32
    return %c0_i32, %c0_i32_0 : i32, i32
  }
  func.func @transform_6(%arg0: i32) -> (i32, i32) {
    %c0_i32 = arith.constant 0 : i32
    %c0_i32_0 = arith.constant 0 : i32
    %c0_i32_1 = arith.constant 0 : i32
    return %c0_i32, %c0_i32_0 : i32, i32
  }
  func.func @transform_7(%arg0: i32) -> (i32, i32) {
    %c0_i32 = arith.constant 0 : i32
    %c0_i32_0 = arith.constant 0 : i32
    return %arg0, %c0_i32 : i32, i32
  }
}

</mosaic_0001>

<bundles_post_ra>
// kernel: tpu_custom_call.1
= control target key start
LH: loop header
LB: loop body
LE: loop exit
PB: predicated region body
PF: predicated region fallthrough
CT: control target
= control target key end

     0   :  { %12 = vsyncpa [#allocation3], 0  ;;  %s774_s0 = inlined_call_operand.vmem [shape: f32[2,64], index: 0, kind: input, shape index: {}]   ;;  %s775_s1 = inlined_call_operand.vmem [shape: bf16[64,128], index: 1, kind: input, shape index: {}]   ;;  %s776_s2 = inlined_call_operand.vmem [shape: bf16[128,64], index: 2, kind: input, shape index: {}]   ;;  %s777_s3 = inlined_call_operand.hbm [shape: bf16[64,64], index: 3, kind: input, shape index: {}]   ;;  %s778_s4 = inlined_call_operand.vmem [shape: f32[64,64], index: 4, kind: input, shape index: {}]   ;;  %s779_s5 = inlined_call_operand.vmem [shape: f32[1,64], index: 5, kind: input, shape index: {}]   ;;  %s780_s6 = inlined_call_operand.vmem [shape: f32[1,64], index: 6, kind: input, shape index: {}]   ;;  %s781_s7 = inlined_call_operand.hbm [shape: f32[2,64], index: 7, kind: output, shape index: {}]  }
   0x1   :  { %13 = vsyncpa [#allocation4], 0  ;;  %s24_s26 = sshll.u32 %s777_s3, 4  ;;  %s640_s27 = smov [#allocation2]   ;;  %s25_s26 = int_to_ptr.hbm [resolvable:$true] %s24_s26 }
   0x2   :  { %s26_s28 = sshll.u32 %s640_s27, 4  ;;  %s641_s29 = smov 64   ;;  %s27_s28 = int_to_ptr.vmem [resolvable:$true] %s26_s28 }
   0x3   :  { %s642_s30 = smov 4  }
   0x4   :  { %32 = dma.hbm_to_vmem [thread:$0]  %s25_s26, 512, %s27_s28, [#allocation3], %s641_s29, %s641_s29, %s642_s30  }
   0x5   :  { %636 = dma.done.wait [#allocation3], 512  }
   0x6   :  { %637 = vsyncadd [#allocation3], 4294966784  ;;  %v563_v0 = vld [vmem:[%s775_s1 + $0x18] sm:$0xff]  ;;  %v562_v2 = vld [vmem:[%s775_s1 + $0x10] sm:$0xff]  ;;  %vm78_vm0 = vcmask 523264   ;;  %vm467_vm10 = vcmask 517120  }
   0x7   :  { %v571_v1 = vld [vmem:[%s776_s2 + $0x38] sm:$0xff]  ;;  %86 = vmatpush.bf16.msra.mxu0 %v563_v0  ;;  %v570_v3 = vld [vmem:[%s776_s2 + $0x30] sm:$0xff]  ;;  %v561_v4 = vld [vmem:[%s775_s1 + $0x8] sm:$0xff] }
   0x8   :  { %161 = vmatpush.bf16.msra.mxu1 %v571_v1  ;;  %v569_v5 = vld [vmem:[%s776_s2 + $0x28] sm:$0xff]  ;;  %v560_v6 = vld [vmem:[%s775_s1] sm:$0xff]  ;;  %v567_v10 = vld [vmem:[%s776_s2 + $0x18] sm:$0xff]  ;;  %s476_s1 = sshll.u32 %s781_s7, 4  ;;  %s477_s1 = int_to_ptr.hbm [resolvable:$true] %s476_s1 }
   0x9   :  { %v44_v7 = vld [vmem:[%s774_s0] sm:$0x3]  ;;  %v566_v11 = vld [vmem:[%s776_s2 + $0x10] sm:$0xff]  ;;  %v565_v12 = vld [vmem:[%s776_s2 + $0x8] sm:$0xff] }
   0xa   :  { %v568_v8 = vld [vmem:[%s776_s2 + $0x20] sm:$0xff]  ;;  %v45_v9 = vpack.c.bf16 %v44_v7, %v44_v7  ;;  %v575_v14 = vld [vmem:[#allocation2 + $0x18] sm:$0xff]  ;;  %v574_v15 = vld [vmem:[#allocation2 + $0x10] sm:$0xff] }
   0xb   :  { %87 = vmatpush.bf16.msra.mxu0 %v562_v2  ;;  %v564_v13 = vld [vmem:[%s776_s2] sm:$0xff]  ;;  %232 = vmatpush.bf16.msra.mxu2 %v575_v14  ;;  %v573_v20 = vld [vmem:[#allocation2 + $0x8] sm:$0xff]  ;;  %v191_v22 = vld [vmem:[%s778_s4 + $0x38] sm:$0xff] }
   0xc   :  { %162 = vmatpush.bf16.msra.mxu1 %v570_v3  ;;  %v572_v21 = vld [vmem:[#allocation2] sm:$0xff]  ;;  %v190_v23 = vld [vmem:[%s778_s4 + $0x30] sm:$0xff]  ;;  %252 = vmatpush.msra.mxu3 %v191_v22  ;;  %v189_v24 = vld [vmem:[%s778_s4 + $0x28] sm:$0xff] }
   0xd   :  { %v188_v25 = vld [vmem:[%s778_s4 + $0x20] sm:$0xff]  ;;  %v187_v26 = vld [vmem:[%s778_s4 + $0x18] sm:$0xff]  ;;  %v186_v27 = vld [vmem:[%s778_s4 + $0x10] sm:$0xff] }
   0xe   :  { %253 = vmatpush.msra.mxu3 %v190_v23  ;;  %v185_v28 = vld [vmem:[%s778_s4 + $0x8] sm:$0xff]  ;;  %v184_v34 = vld [vmem:[%s778_s4] sm:$0xff] }
   0xf   :  { %88 = vmatpush.bf16.msra.mxu0 %v561_v4  ;;  %233 = vmatpush.bf16.msra.mxu2 %v574_v15  ;;  %v757_v49 = vld [vmem:[%s779_s5] ss:$0 sm:$0xff]  ;;  %s643_s5 = smov [#allocation5]  }
  0x10   :  { %163 = vmatpush.bf16.msra.mxu1 %v569_v5  ;;  %254 = vmatpush.msra.mxu3 %v189_v24  ;;  %v581_v52 = vld [vmem:[%s780_s6] ss:$0 sm:$0xff]  ;;  %s474_s6 = sshll.u32 %s643_s5, 4  ;;  %s475_s6 = int_to_ptr.vmem [resolvable:$true] %s474_s6 }
  0x12   :  { %255 = vmatpush.msra.mxu3 %v188_v25 }
  0x13   :  { %89 = vmatpush.bf16.msra.mxu0 %v560_v6  ;;  %234 = vmatpush.bf16.msra.mxu2 %v573_v20 }
  0x14   :  { %164 = vmatpush.bf16.msra.mxu1 %v568_v8  ;;  %256 = vmatpush.msra.mxu3 %v187_v26 }
  0x16   :  { %502 = vmatmul.msk.bf16.vlgmr.msra.gmra.mxu0 %vm78_vm0, %v45_v9  ;;  %257 = vmatpush.msra.mxu3 %v186_v27 }
  0x17   :  { %235 = vmatpush.bf16.msra.mxu2 %v572_v21  ;;  %276 = vmatpush.msrb.mxu0 %v191_v22 }
  0x18   :  { %165 = vmatpush.bf16.msra.mxu1 %v567_v10  ;;  %258 = vmatpush.msra.mxu3 %v185_v28 }
  0x19   :  { %277 = vmatpush.msrb.mxu0 %v190_v23 }
  0x1a   :  { %259 = vmatpush.msra.mxu3 %v184_v34 }
  0x1b   :  { %313 = vmatpush.bf16.msrb.mxu2 %v575_v14  ;;  %278 = vmatpush.msrb.mxu0 %v189_v24 }
  0x1c   :  { %166 = vmatpush.bf16.msra.mxu1 %v566_v11  ;;  %333 = vmatpush.msrb.mxu3 %v191_v22 }
  0x1d   :  { %279 = vmatpush.msrb.mxu0 %v188_v25 }
  0x1e   :  { %334 = vmatpush.msrb.mxu3 %v190_v23 }
  0x1f   :  { %314 = vmatpush.bf16.msrb.mxu2 %v574_v15  ;;  %280 = vmatpush.msrb.mxu0 %v187_v26 }
  0x20   :  { %167 = vmatpush.bf16.msra.mxu1 %v565_v12  ;;  %335 = vmatpush.msrb.mxu3 %v189_v24 }
  0x21   :  { %281 = vmatpush.msrb.mxu0 %v186_v27 }
  0x22   :  { %336 = vmatpush.msrb.mxu3 %v188_v25 }
  0x23   :  { %315 = vmatpush.bf16.msrb.mxu2 %v573_v20  ;;  %282 = vmatpush.msrb.mxu0 %v185_v28 }
  0x24   :  { %168 = vmatpush.bf16.msra.mxu1 %v564_v13  ;;  %337 = vmatpush.msrb.mxu3 %v187_v26 }
  0x25   :  { %283 = vmatpush.msrb.mxu0 %v184_v34 }
  0x26   :  { %338 = vmatpush.msrb.mxu3 %v186_v27 }
  0x27   :  { %316 = vmatpush.bf16.msrb.mxu2 %v572_v21  ;;  %357 = vmatpush.msra.mxu0 %v191_v22 }
  0x28   :  { %394 = vmatpush.bf16.msrb.mxu1 %v575_v14  ;;  %339 = vmatpush.msrb.mxu3 %v185_v28 }
  0x29   :  { %358 = vmatpush.msra.mxu0 %v190_v23 }
  0x2a   :  { %340 = vmatpush.msrb.mxu3 %v184_v34 }
  0x2b   :  { %359 = vmatpush.msra.mxu0 %v189_v24 }
  0x2c   :  { %395 = vmatpush.bf16.msrb.mxu1 %v574_v15 }
  0x2d   :  { %360 = vmatpush.msra.mxu0 %v188_v25 }
  0x2f   :  { %361 = vmatpush.msra.mxu0 %v187_v26 }
  0x30   :  { %396 = vmatpush.bf16.msrb.mxu1 %v573_v20 }
  0x31   :  { %362 = vmatpush.msra.mxu0 %v186_v27 }
  0x33   :  { %363 = vmatpush.msra.mxu0 %v185_v28 }
  0x34   :  { %397 = vmatpush.bf16.msrb.mxu1 %v572_v21 }
  0x35   :  { %364 = vmatpush.msra.mxu0 %v184_v34 }
  0x93   :  { %v91_v16 = vpop.f32.mrf.mxu0 }
  0x94   :  { %v95_v17 = vmax.f32 %v91_v16, 0.0 }
  0x96   :  { %v96_v18 = vpack.c.bf16 %v95_v17, %v95_v17 }
  0x98   :  { %169 = vmatmul.bf16.vlgmr.msra.gmra.mxu1 %v96_v18 }
  0x9b   :  { %v93_v19 = vpop.f32.mrf.mxu0 }
 0x115   :  { %v170_v29 = vpop.f32.mrf.mxu1 }
 0x116   :  { %v174_v30 = vmax.f32 %v170_v29, 0.0 }
 0x118   :  { %v175_v31 = vmul.f32 %v174_v30, %v44_v7 }
 0x11a   :  { %v200_v32 = vpack.c.bf16 %v175_v31, %v175_v31 }
 0x11c   :  { %551 = vmatmul.msk.bf16.vlgmr.msra.gmra.mxu2 %vm78_vm0, %v200_v32 }
 0x11d   :  { %v172_v33 = vpop.f32.mrf.mxu1  ;;  %414 = vmatpush.msra.mxu2 %v191_v22 }
 0x11f   :  { %415 = vmatpush.msra.mxu2 %v190_v23 }
 0x121   :  { %416 = vmatpush.msra.mxu2 %v189_v24 }
 0x123   :  { %417 = vmatpush.msra.mxu2 %v188_v25 }
 0x125   :  { %418 = vmatpush.msra.mxu2 %v187_v26 }
 0x127   :  { %419 = vmatpush.msra.mxu2 %v186_v27 }
 0x129   :  { %420 = vmatpush.msra.mxu2 %v185_v28 }
 0x12b   :  { %421 = vmatpush.msra.mxu2 %v184_v34 }
 0x19f   :  { %v237_v35 = vpop.f32.mrf.mxu2 }
 0x1a0   :  { %v264_v36 = vmul.f32 %v237_v35, %v237_v35  ;;  %552 = vmatmul.msk.f32.vlgmr.msra.gmra.mxu3 %vm78_vm0, %v237_v35 }
 0x1a1   :  { %438 = vmatpush.msra.mxu3 %v191_v22 }
 0x1a2   :  { %553 = vmatmul.msk.f32.vlgmr.msrb.gmra.mxu0 %vm78_vm0, %v264_v36 }
 0x1a3   :  { %439 = vmatpush.msra.mxu3 %v190_v23 }
 0x1a5   :  { %440 = vmatpush.msra.mxu3 %v189_v24 }
 0x1a7   :  { %v239_v37 = vpop.f32.mrf.mxu2  ;;  %441 = vmatpush.msra.mxu3 %v188_v25 }
 0x1a9   :  { %442 = vmatpush.msra.mxu3 %v187_v26 }
 0x1ab   :  { %443 = vmatpush.msra.mxu3 %v186_v27 }
 0x1ad   :  { %444 = vmatpush.msra.mxu3 %v185_v28 }
 0x1af   :  { %445 = vmatpush.msra.mxu3 %v184_v34 }
 0x21f   :  { %v285_v40 = vpop.f32.mrf.mxu0 }
 0x223   :  { %v261_v38 = vpop.f32.mrf.mxu3 }
 0x224   :  { %v288_v39 = vmul.f32 %v261_v38, %v261_v38  ;;  %v290_v50 = vsub.f32 %v237_v35, %v261_v38 }
 0x226   :  { %v289_v41 = vsub.f32 %v285_v40, %v288_v39 }
 0x228   :  { %v291_v42 = vadd.f32 1e-05, %v289_v41 }
 0x22a   :  { %582 = vrsqrt.f32 %v291_v42  ;;  %vm298_vm2 = vweird.f32 %v291_v42 }
 0x230   :  { %v583_v43 = vpop.eup %582 }
 0x231   :  { %v293_v44 = vmul.f32 %v583_v43, %v291_v42  ;;  %vm299_vm1 = vweird.f32 %v583_v43 }
 0x232   :  { %vm300_vm3 = vmor %vm298_vm2, %vm299_vm1 }
 0x233   :  { %v294_v45 = vmul.f32 %v583_v43, %v293_v44 }
 0x235   :  { %v295_v46 = vmul.f32 0.5, %v294_v45 }
 0x237   :  { %v296_v47 = vsub.f32 1.5, %v295_v46 }
 0x239   :  { %v297_v48 = vmul.f32 %v583_v43, %v296_v47 }
 0x23b   :  { %v301_v51 = vsel %vm300_vm3, %v583_v43, %v297_v48 }
 0x23c   :  { %v302_v53 = vmul.f32 %v301_v51, %v290_v50 }
 0x23e   :  { %v303_v54 = vmul.f32 %v757_v49, %v302_v53 }
 0x240   :  { %v304_v55 = vadd.f32 %v581_v52, %v303_v54 }
 0x242   :  { %v305_v56 = vpack.c.bf16 %v304_v55, %v304_v55 }
 0x244   :  { %554 = vmatmul.msk.bf16.vlgmr.msrb.gmra.mxu2 %vm78_vm0, %v305_v56 }
 0x2c7   :  { %v318_v57 = vpop.f32.mrf.mxu2 }
 0x2c8   :  { %v345_v58 = vmul.f32 %v318_v57, %v318_v57  ;;  %555 = vmatmul.msk.f32.vlgmr.msrb.gmra.mxu3 %vm78_vm0, %v318_v57 }
 0x2ca   :  { %556 = vmatmul.msk.f32.vlgmr.msra.gmra.mxu0 %vm78_vm0, %v345_v58 }
 0x2cf   :  { %v320_v59 = vpop.f32.mrf.mxu2 }
 0x347   :  { %v366_v62 = vpop.f32.mrf.mxu0 }
 0x34b   :  { %v342_v60 = vpop.f32.mrf.mxu3 }
 0x34c   :  { %v369_v61 = vmul.f32 %v342_v60, %v342_v60  ;;  %v371_v7 = vsub.f32 %v318_v57, %v342_v60 }
 0x34e   :  { %v370_v63 = vsub.f32 %v366_v62, %v369_v61 }
 0x350   :  { %v372_v0 = vadd.f32 1e-05, %v370_v63 }
 0x352   :  { %584 = vrsqrt.f32 %v372_v0  ;;  %vm379_vm5 = vweird.f32 %v372_v0 }
 0x358   :  { %v585_v1 = vpop.eup %584 }
 0x359   :  { %v374_v2 = vmul.f32 %v585_v1, %v372_v0  ;;  %vm380_vm4 = vweird.f32 %v585_v1 }
 0x35a   :  { %vm381_vm6 = vmor %vm379_vm5, %vm380_vm4 }
 0x35b   :  { %v375_v3 = vmul.f32 %v585_v1, %v374_v2 }
 0x35d   :  { %v376_v4 = vmul.f32 0.5, %v375_v3 }
 0x35f   :  { %v377_v5 = vsub.f32 1.5, %v376_v4 }
 0x361   :  { %v378_v6 = vmul.f32 %v585_v1, %v377_v5 }
 0x363   :  { %v382_v8 = vsel %vm381_vm6, %v585_v1, %v378_v6 }
 0x364   :  { %v383_v9 = vmul.f32 %v382_v8, %v371_v7 }
 0x366   :  { %v384_v10 = vmul.f32 %v757_v49, %v383_v9 }
 0x368   :  { %v385_v11 = vadd.f32 %v581_v52, %v384_v10 }
 0x36a   :  { %v386_v12 = vpack.c.bf16 %v385_v11, %v385_v11 }
 0x36c   :  { %557 = vmatmul.msk.bf16.vlgmr.msrb.gmra.mxu1 %vm78_vm0, %v386_v12 }
 0x3e9   :  { %v399_v13 = vpop.f32.mrf.mxu1 }
 0x3ea   :  { %v426_v14 = vmul.f32 %v399_v13, %v399_v13  ;;  %558 = vmatmul.msk.f32.vlgmr.msra.gmra.mxu2 %vm78_vm0, %v399_v13 }
 0x3ec   :  { %559 = vmatmul.msk.f32.vlgmr.msra.gmra.mxu3 %vm78_vm0, %v426_v14 }
 0x3f1   :  { %v401_v15 = vpop.f32.mrf.mxu1 }
 0x46d   :  { %v423_v16 = vpop.f32.mrf.mxu2 }
 0x46e   :  { %v450_v17 = vmul.f32 %v423_v16, %v423_v16  ;;  %v452_v27 = vsub.f32 %v399_v13, %v423_v16 }
 0x46f   :  { %v447_v18 = vpop.f32.mrf.mxu3 }
 0x470   :  { %v451_v19 = vsub.f32 %v447_v18, %v450_v17 }
 0x472   :  { %v453_v20 = vadd.f32 1e-05, %v451_v19 }
 0x474   :  { %586 = vrsqrt.f32 %v453_v20  ;;  %vm460_vm8 = vweird.f32 %v453_v20 }
 0x47a   :  { %v587_v21 = vpop.eup %586 }
 0x47b   :  { %v455_v22 = vmul.f32 %v587_v21, %v453_v20  ;;  %vm461_vm7 = vweird.f32 %v587_v21 }
 0x47c   :  { %vm462_vm9 = vmor %vm460_vm8, %vm461_vm7 }
 0x47d   :  { %v456_v23 = vmul.f32 %v587_v21, %v455_v22 }
 0x47f   :  { %v457_v24 = vmul.f32 0.5, %v456_v23 }
 0x481   :  { %v458_v25 = vsub.f32 1.5, %v457_v24 }
 0x483   :  { %v459_v26 = vmul.f32 %v587_v21, %v458_v25 }
 0x485   :  { %v463_v28 = vsel %vm462_vm9, %v587_v21, %v459_v26 }
 0x486   :  { %v464_v29 = vmul.f32 %v463_v28, %v452_v27 }
 0x488   :  { %v465_v30 = vmul.f32 %v757_v49, %v464_v29 }
 0x48a   :  { %v466_v31 = vadd.f32 %v581_v52, %v465_v30 }
 0x48c   :  { %468 = vst.msk [vmem:[#allocation5] sm:$0x3] %vm467_vm10, %v466_v31 }
 0x48d   :  { %479 = dma.vmem_to_hbm [thread:$0]  %s475_s6, 32, %s477_s1, [#allocation4]  }
 0x48e   :  { %638 = dma.done.wait [#allocation4], 32  }
 0x48f   :  { %639 = vsyncadd [#allocation4], 4294967264 }
 0x490   :  { %484 = vsyncpa [#allocation3], 1 }
 0x491   :  { %485 = vsyncpa [#allocation4], 1 }

</bundles_post_ra>
